<compile_context>
chip_gen: v7x
topology: tpu7x:2x2x1
jax: 0.10.0
libtpu: 0.0.40
codegen_flags: <defaults>
</compile_context>

<pallas_src>
import jax
import jax.numpy as jnp
from jax.experimental import pallas as pl
from jax.experimental.pallas import tpu as pltpu

NUM_TASKS = 3
N_FEATURES = 512      # resnet18 fc.in_features
HIDDEN = 32           # nn.Linear(F//8, 32)
OUT = 2               # nn.Linear(32, 2)
BATCH = 2
LANE = 128


def _round_up(x, m=LANE):
    return ((x + m - 1) // m) * m


def _bias_layout(T, F):
    """128-aligned segment offsets inside the coalesced f32 bias/scores buffer."""
    F2, F4 = F // 2, F // 4
    off_b1 = 0
    off_b2 = off_b1 + _round_up(T * F2)
    off_b34 = off_b2 + _round_up(T * F4)
    off_b5 = off_b34 + _round_up(T * HIDDEN)
    off_sc = off_b5 + _round_up(T * OUT)
    total = off_sc + _round_up(T * OUT)
    return off_b1, off_b2, off_b34, off_b5, off_sc, total


def make_kernel(T, F):
    F2, F4 = F // 2, F // 4
    H, O = HIDDEN, OUT
    off_b1, off_b2, off_b34, off_b5, off_sc, _ = _bias_layout(T, F)
    row_w34 = T * F2                 # row offsets inside the coalesced weight slab
    row_w5 = row_w34 + T * F4

    def kernel(x_ref, w1_ref, wt_ref, b_ref, out_ref):
        # x: (B,F) f32   w1: (F, T*F2) bf16   wt: (T*F2 + T*F4 + T*H, 128) bf16
        # b: (1, total) f32 (biases + softmaxed scores)   out: (B, T*O) f32
        x = x_ref[...].astype(jnp.bfloat16)

        # layer 1 fused across all tasks: one wide lane-dense matmul
        h1 = jnp.dot(x, w1_ref[...], preferred_element_type=jnp.float32)
        h1 = h1 + b_ref[:, off_b1:off_b1 + T * F2]
        h1 = jnp.maximum(h1, 0.0).astype(jnp.bfloat16)          # single wide cast

        # layer 2 per task (static unroll); outputs concatenated along lanes
        parts = []
        for t in range(T):
            w2_t = wt_ref[t * F2:(t + 1) * F2, :]               # (F2, F4)
            b2_t = b_ref[:, off_b2 + t * F4: off_b2 + (t + 1) * F4]
            h2 = jnp.dot(h1[:, t * F2:(t + 1) * F2], w2_t,
                         preferred_element_type=jnp.float32) + b2_t
            parts.append(jnp.maximum(h2, 0.0))
        h2 = jnp.concatenate(parts, axis=-1).astype(jnp.bfloat16)   # (B, T*F4)

        # fused tail: block-diag (W3 @ W4) + ReLU, then block-diag W5
        w34 = wt_ref[row_w34:row_w34 + T * F4, 0:T * H]         # (T*F4, T*H)
        h34 = jnp.dot(h2, w34, preferred_element_type=jnp.float32)
        h34 = h34 + b_ref[:, off_b34:off_b34 + T * H]
        h34 = jnp.maximum(h34, 0.0).astype(jnp.bfloat16)        # (B, T*H)

        w5 = wt_ref[row_w5:row_w5 + T * H, 0:T * O]             # (T*H, T*O)
        y = jnp.dot(h34, w5, preferred_element_type=jnp.float32)
        y = y + b_ref[:, off_b5:off_b5 + T * O]                 # (B, T*O)

        # single broadcast scores multiply + one lane-dense store
        out_ref[...] = b_ref[:, off_sc:off_sc + T * O] * y

    return kernel


def attention_parallel_heads(features, attention_weights, packed):
    """features: (B, F) f32 backbone output; attention_weights: (T,) f32;
    packed = (w1, wtail, bias_const) from pack_params. Returns (T, B, 2)."""
    w1, wtail, bias_const = packed
    T = attention_weights.shape[0]
    B, F = features.shape
    *_, off_sc, total = _bias_layout(T, F)

    # 3-element softmax + lane broadcast: trivial glue kept in plain JAX and
    # folded into the coalesced bias buffer (no extra tiny DMA for scores).
    scores = jax.nn.softmax(attention_weights.astype(jnp.float32), axis=0)
    scores_vec = jnp.repeat(scores, OUT)[None, :]                      # (1, T*O)
    scores_seg = jnp.pad(scores_vec, ((0, 0), (0, (total - off_sc) - T * OUT)))
    bias_full = jnp.concatenate([bias_const, scores_seg], axis=1)      # (1, total)

    vmem = pl.BlockSpec(memory_space=pltpu.MemorySpace.VMEM)
    out = pl.pallas_call(
        make_kernel(T, F),
        out_shape=jax.ShapeDtypeStruct((B, T * OUT), jnp.float32),
        in_specs=[vmem, vmem, vmem, vmem],
        out_specs=vmem,
    )(features, w1, wtail, bias_full)
    # lane-dense (B, T*O) kernel output -> list-of-task layout (T, B, O)
    return jnp.transpose(out.reshape(B, T, OUT), (1, 0, 2))


def init_params(key, T, F):
    """Create PyTorch-layout params; reduce 3x3 convs to their center tap."""
    F2, F4, F8 = F // 2, F // 4, F // 8
    keys = jax.random.split(key, 10)
    ki = iter(range(10))
    conv_shapes = [(F2, F), (F4, F2), (F8, F4)]      # (cout, cin)
    lin_shapes = [(HIDDEN, F8), (OUT, HIDDEN)]
    ws_t, bs_t = [], []                              # (T, d_in, d_out) / (T, 1, d_out)
    for cout, cin in conv_shapes:
        w = 0.05 * jax.random.normal(keys[next(ki)], (T, cout, cin, 3, 3), jnp.float32)
        b = 0.05 * jax.random.normal(keys[next(ki)], (T, cout), jnp.float32)
        # 1x1 spatial input + padding=1, stride=1 -> only center tap [.,.,1,1] contributes
        ws_t.append(jnp.transpose(w[:, :, :, 1, 1], (0, 2, 1)))
        bs_t.append(b[:, None, :])
    for cout, cin in lin_shapes:
        w = 0.05 * jax.random.normal(keys[next(ki)], (T, cout, cin), jnp.float32)
        b = 0.05 * jax.random.normal(keys[next(ki)], (T, cout), jnp.float32)
        ws_t.append(jnp.transpose(w, (0, 2, 1)))
        bs_t.append(b[:, None, :])
    attn = jnp.ones((T,), jnp.float32)               # nn.Parameter(torch.ones(T))
    return attn, ws_t, bs_t


def _block_diag(blocks):
    n = len(blocks)
    r, c = blocks[0].shape
    m = jnp.zeros((n * r, n * c), blocks[0].dtype)
    for t, blk in enumerate(blocks):
        m = m.at[t * r:(t + 1) * r, t * c:(t + 1) * c].set(blk)
    return m


def pack_params(ws_t, bs_t, T, F):
    """Pack params for the kernel (composition in f32, single bf16 cast)."""
    F2, F4 = F // 2, F // 4
    W1, W2, W3, W4, W5 = ws_t                        # (T, d_in, d_out) f32
    b1, b2, b3, b4, b5 = [b[:, 0, :] for b in bs_t]  # (T, d_out) f32

    # layer-1 output-dim fusion across tasks: (T,F,F2) -> (F, T*F2)
    w1 = jnp.transpose(W1, (1, 0, 2)).reshape(F, T * F2).astype(jnp.bfloat16)

    # fold ReLU-free layer 3 into layer 4 (in f32), then block-diagonalize the tail
    W34 = jnp.einsum('tij,tjk->tik', W3, W4)                     # (T, F4, H)
    b34 = jnp.einsum('tj,tjk->tk', b3, W4) + b4                  # (T, H)
    w34_bd = _block_diag([W34[t] for t in range(T)])             # (T*F4, T*H)
    w5_bd = _block_diag([W5[t] for t in range(T)])               # (T*H, T*O)

    # coalesced bf16 tail-weight slab: rows = [W2 per task | W34_bd | W5_bd], lanes = F4
    lw = F4
    pad = lambda m: jnp.pad(m, ((0, 0), (0, lw - m.shape[1])))
    wtail = jnp.concatenate(
        [W2.reshape(T * F2, F4), pad(w34_bd), pad(w5_bd)], axis=0
    ).astype(jnp.bfloat16)                                       # (T*F2 + T*F4 + T*H, 128)

    # coalesced f32 bias buffer with 128-aligned segments (scores appended per call)
    off_b1, off_b2, off_b34, off_b5, off_sc, _ = _bias_layout(T, F)

    def seg(v, width):
        v = v.reshape(1, -1)
        return jnp.pad(v, ((0, 0), (0, width - v.shape[1])))

    bias_const = jnp.concatenate([
        seg(b1.reshape(-1), off_b2 - off_b1),
        seg(b2.reshape(-1), off_b34 - off_b2),
        seg(b34.reshape(-1), off_b5 - off_b34),
        seg(b5.reshape(-1), off_sc - off_b5),
    ], axis=1)                                                   # (1, off_sc)
    return w1, wtail, bias_const


def reference(features, attn, ws_t, bs_t):
    """Pure f32 per-task 5-layer reference (original module structure)."""
    scores = jax.nn.softmax(attn, axis=0)
    outs = []
    for t in range(attn.shape[0]):
        h = features
        h = jnp.maximum(h @ ws_t[0][t] + bs_t[0][t], 0.0)
        h = jnp.maximum(h @ ws_t[1][t] + bs_t[1][t], 0.0)
        h = h @ ws_t[2][t] + bs_t[2][t]
        h = jnp.maximum(h @ ws_t[3][t] + bs_t[3][t], 0.0)
        h = h @ ws_t[4][t] + bs_t[4][t]
        outs.append(scores[t] * h)
    return jnp.stack(outs)


if __name__ == "__main__":
    key = jax.random.PRNGKey(0)
    k_params, k_feat = jax.random.split(key)

    attn, ws_t, bs_t = init_params(k_params, NUM_TASKS, N_FEATURES)
    packed = pack_params(ws_t, bs_t, NUM_TASKS, N_FEATURES)
    # backbone output features (what resnet18 with fc=Identity would emit)
    features = jax.random.normal(k_feat, (BATCH, N_FEATURES), jnp.float32)

    run = jax.jit(attention_parallel_heads)
    out = jax.block_until_ready(run(features, attn, packed))

    ref = reference(features, attn, ws_t, bs_t)
    assert out.shape == (NUM_TASKS, BATCH, OUT)
    assert jnp.allclose(out, ref, atol=2e-2, rtol=2e-2), "mismatch vs JAX reference"

    # list of per-task outputs, as the PyTorch forward returns
    task_outputs = [out[t] for t in range(NUM_TASKS)]
    print("KERNEL_OK")
</pallas_src>

<mosaic_0001>
module attributes {stable_mosaic.version = 11 : i64} {
  func.func @kernel(%arg0: memref<2x512xf32, #tpu.memory_space<vmem>>, %arg1: memref<512x768xbf16, #tpu.memory_space<vmem>>, %arg2: memref<1248x128xbf16, #tpu.memory_space<vmem>>, %arg3: memref<1x1536xf32, #tpu.memory_space<vmem>>, %arg4: memref<2x6xf32, #tpu.memory_space<vmem>>) attributes {dimension_semantics = [], scalar_prefetch = 0 : i64, scratch_operands = 0 : i64, tpu.core_type = #tpu.core_type<tc>} {
    %c0 = arith.constant 0 : index
    %c0_0 = arith.constant 0 : index
    %0 = vector.load %arg0[%c0, %c0_0] : memref<2x512xf32, #tpu.memory_space<vmem>>, vector<2x512xf32>
    %1 = arith.truncf %0 : vector<2x512xf32> to vector<2x512xbf16>
    %c0_1 = arith.constant 0 : index
    %c0_2 = arith.constant 0 : index
    %2 = vector.load %arg1[%c0_1, %c0_2] : memref<512x768xbf16, #tpu.memory_space<vmem>>, vector<512x768xbf16>
    %cst = arith.constant dense<0.000000e+00> : vector<2x768xf32>
    %3 = tpu.matmul %1, %2, %cst {dimension_numbers = #tpu.dot_dimension_numbers<[1], [0], [0], [1], [0, 0, 1, 1], [], []>} : vector<2x512xbf16>, vector<512x768xbf16>, vector<2x768xf32> -> vector<2x768xf32>
    %c0_3 = arith.constant 0 : index
    %c0_4 = arith.constant 0 : index
    %4 = vector.load %arg3[%c0_3, %c0_4] : memref<1x1536xf32, #tpu.memory_space<vmem>>, vector<1x768xf32>
    %5 = vector.broadcast %4 : vector<1x768xf32> to vector<2x768xf32>
    %6 = arith.addf %3, %5 : vector<2x768xf32>
    %cst_5 = arith.constant 0.000000e+00 : f32
    %7 = vector.broadcast %cst_5 : f32 to vector<2x768xf32>
    %8 = arith.maximumf %6, %7 : vector<2x768xf32>
    %9 = arith.truncf %8 : vector<2x768xf32> to vector<2x768xbf16>
    %c0_6 = arith.constant 0 : index
    %c0_7 = arith.constant 0 : index
    %10 = vector.load %arg2[%c0_6, %c0_7] : memref<1248x128xbf16, #tpu.memory_space<vmem>>, vector<256x128xbf16>
    %c0_8 = arith.constant 0 : index
    %c768 = arith.constant 768 : index
    %11 = vector.load %arg3[%c0_8, %c768] : memref<1x1536xf32, #tpu.memory_space<vmem>>, vector<1x128xf32>
    %12 = vector.extract_strided_slice %9 {offsets = [0, 0], sizes = [2, 256], strides = [1, 1]} : vector<2x768xbf16> to vector<2x256xbf16>
    %cst_9 = arith.constant dense<0.000000e+00> : vector<2x128xf32>
    %13 = tpu.matmul %12, %10, %cst_9 {dimension_numbers = #tpu.dot_dimension_numbers<[1], [0], [0], [1], [0, 0, 1, 1], [], []>} : vector<2x256xbf16>, vector<256x128xbf16>, vector<2x128xf32> -> vector<2x128xf32>
    %14 = vector.broadcast %11 : vector<1x128xf32> to vector<2x128xf32>
    %15 = arith.addf %13, %14 : vector<2x128xf32>
    %cst_10 = arith.constant 0.000000e+00 : f32
    %16 = vector.broadcast %cst_10 : f32 to vector<2x128xf32>
    %17 = arith.maximumf %15, %16 : vector<2x128xf32>
    %c256 = arith.constant 256 : index
    %c0_11 = arith.constant 0 : index
    %18 = vector.load %arg2[%c256, %c0_11] : memref<1248x128xbf16, #tpu.memory_space<vmem>>, vector<256x128xbf16>
    %c0_12 = arith.constant 0 : index
    %c896 = arith.constant 896 : index
    %19 = vector.load %arg3[%c0_12, %c896] : memref<1x1536xf32, #tpu.memory_space<vmem>>, vector<1x128xf32>
    %20 = vector.extract_strided_slice %9 {offsets = [0, 256], sizes = [2, 256], strides = [1, 1]} : vector<2x768xbf16> to vector<2x256xbf16>
    %cst_13 = arith.constant dense<0.000000e+00> : vector<2x128xf32>
    %21 = tpu.matmul %20, %18, %cst_13 {dimension_numbers = #tpu.dot_dimension_numbers<[1], [0], [0], [1], [0, 0, 1, 1], [], []>} : vector<2x256xbf16>, vector<256x128xbf16>, vector<2x128xf32> -> vector<2x128xf32>
    %22 = vector.broadcast %19 : vector<1x128xf32> to vector<2x128xf32>
    %23 = arith.addf %21, %22 : vector<2x128xf32>
    %cst_14 = arith.constant 0.000000e+00 : f32
    %24 = vector.broadcast %cst_14 : f32 to vector<2x128xf32>
    %25 = arith.maximumf %23, %24 : vector<2x128xf32>
    %c512 = arith.constant 512 : index
    %c0_15 = arith.constant 0 : index
    %26 = vector.load %arg2[%c512, %c0_15] : memref<1248x128xbf16, #tpu.memory_space<vmem>>, vector<256x128xbf16>
    %c0_16 = arith.constant 0 : index
    %c1024 = arith.constant 1024 : index
    %27 = vector.load %arg3[%c0_16, %c1024] : memref<1x1536xf32, #tpu.memory_space<vmem>>, vector<1x128xf32>
    %28 = vector.extract_strided_slice %9 {offsets = [0, 512], sizes = [2, 256], strides = [1, 1]} : vector<2x768xbf16> to vector<2x256xbf16>
    %cst_17 = arith.constant dense<0.000000e+00> : vector<2x128xf32>
    %29 = tpu.matmul %28, %26, %cst_17 {dimension_numbers = #tpu.dot_dimension_numbers<[1], [0], [0], [1], [0, 0, 1, 1], [], []>} : vector<2x256xbf16>, vector<256x128xbf16>, vector<2x128xf32> -> vector<2x128xf32>
    %30 = vector.broadcast %27 : vector<1x128xf32> to vector<2x128xf32>
    %31 = arith.addf %29, %30 : vector<2x128xf32>
    %cst_18 = arith.constant 0.000000e+00 : f32
    %32 = vector.broadcast %cst_18 : f32 to vector<2x128xf32>
    %33 = arith.maximumf %31, %32 : vector<2x128xf32>
    %34 = tpu.concatenate %17, %25, %33 in 1 : vector<2x128xf32>, vector<2x128xf32>, vector<2x128xf32> -> vector<2x384xf32>
    %35 = arith.truncf %34 : vector<2x384xf32> to vector<2x384xbf16>
    %c768_19 = arith.constant 768 : index
    %c0_20 = arith.constant 0 : index
    %36 = vector.load %arg2[%c768_19, %c0_20] : memref<1248x128xbf16, #tpu.memory_space<vmem>>, vector<384x96xbf16>
    %cst_21 = arith.constant dense<0.000000e+00> : vector<2x96xf32>
    %37 = tpu.matmul %35, %36, %cst_21 {dimension_numbers = #tpu.dot_dimension_numbers<[1], [0], [0], [1], [0, 0, 1, 1], [], []>} : vector<2x384xbf16>, vector<384x96xbf16>, vector<2x96xf32> -> vector<2x96xf32>
    %c0_22 = arith.constant 0 : index
    %c1152 = arith.constant 1152 : index
    %38 = vector.load %arg3[%c0_22, %c1152] : memref<1x1536xf32, #tpu.memory_space<vmem>>, vector<1x96xf32>
    %39 = vector.broadcast %38 : vector<1x96xf32> to vector<2x96xf32>
    %40 = arith.addf %37, %39 : vector<2x96xf32>
    %cst_23 = arith.constant 0.000000e+00 : f32
    %41 = vector.broadcast %cst_23 : f32 to vector<2x96xf32>
    %42 = arith.maximumf %40, %41 : vector<2x96xf32>
    %43 = arith.truncf %42 : vector<2x96xf32> to vector<2x96xbf16>
    %c1152_24 = arith.constant 1152 : index
    %c0_25 = arith.constant 0 : index
    %44 = vector.load %arg2[%c1152_24, %c0_25] : memref<1248x128xbf16, #tpu.memory_space<vmem>>, vector<96x6xbf16>
    %cst_26 = arith.constant dense<0.000000e+00> : vector<2x6xf32>
    %45 = tpu.matmul %43, %44, %cst_26 {dimension_numbers = #tpu.dot_dimension_numbers<[1], [0], [0], [1], [0, 0, 1, 1], [], []>} : vector<2x96xbf16>, vector<96x6xbf16>, vector<2x6xf32> -> vector<2x6xf32>
    %c0_27 = arith.constant 0 : index
    %c1280 = arith.constant 1280 : index
    %46 = vector.load %arg3[%c0_27, %c1280] : memref<1x1536xf32, #tpu.memory_space<vmem>>, vector<1x6xf32>
    %47 = vector.broadcast %46 : vector<1x6xf32> to vector<2x6xf32>
    %48 = arith.addf %45, %47 : vector<2x6xf32>
    %c0_28 = arith.constant 0 : index
    %c1408 = arith.constant 1408 : index
    %49 = vector.load %arg3[%c0_28, %c1408] : memref<1x1536xf32, #tpu.memory_space<vmem>>, vector<1x6xf32>
    %50 = vector.broadcast %49 : vector<1x6xf32> to vector<2x6xf32>
    %51 = arith.mulf %50, %48 : vector<2x6xf32>
    %c0_29 = arith.constant 0 : index
    %c0_30 = arith.constant 0 : index
    %52 = vector.load %arg4[%c0_29, %c0_30] : memref<2x6xf32, #tpu.memory_space<vmem>>, vector<2x6xf32>
    tpu.vector_store %arg4[%c0_29, %c0_30], %51 {strides = array<i32>} : memref<2x6xf32, #tpu.memory_space<vmem>>, vector<2x6xf32>,
    return
  }
}

</mosaic_0001>

<bundles_post_ra>
// kernel: attention_parallel_heads.1
= control target key start
LH: loop header
LB: loop body
LE: loop exit
PB: predicated region body
PF: predicated region fallthrough
CT: control target
= control target key end

     0   :  { %9 = vsyncpa [#allocation3], 0  ;;  %s3447_s0 = inlined_call_operand.vmem [shape: f32[2,512], index: 0, kind: input, shape index: {}]   ;;  %s3448_s1 = inlined_call_operand.hbm [shape: bf16[512,768], index: 1, kind: input, shape index: {}]   ;;  %s3449_s2 = inlined_call_operand.hbm [shape: bf16[1248,128], index: 2, kind: input, shape index: {}]   ;;  %s3450_s3 = inlined_call_operand.vmem [shape: f32[1,1536], index: 3, kind: input, shape index: {}]   ;;  %s3451_s4 = inlined_call_operand.vmem [shape: f32[2,6], index: 4, kind: output, shape index: {}]  }
   0x1   :  { %10 = vsyncpa [#allocation5], 0  ;;  %s3301_s15 = smov [#allocation2]   ;;  %s3253_s19 = scalar_lea.hbm %s3448_s1, 24576 }
   0x2   :  { %s18_s16 = sshll.u32 %s3301_s15, 4  ;;  %p3254_p0 = scmp.ne.s32.totalorder %s3448_s1, %s3253_s19  ;;  %s19_s16 = int_to_ptr.vmem [resolvable:$true] %s18_s16 }
   0x3   :  { %p3257_p1 = scmp.lt.u32.totalorder %s3253_s19, %s3448_s1 }
   0x5   :  { %p3259_p2 = pnand %p3257_p1, %p3254_p0 }
   0x7   :  { %3262 = shalt.err (!%p3259_p2)
}
   0x8   :  { %s3263_s24 = scalar_lea.vmem %s19_s16, 24576  ;;  %p3268_p4 = scmp.lt.s32.totalorder %s19_s16, %s19_s16 }
   0x9   :  { %p3264_p3 = scmp.ne.s32.totalorder %s19_s16, %s3263_s24  ;;  %p3269_p5 = scmp.lt.s32.totalorder %s3263_s24, %s3263_s24 }
   0xb   :  { %p3270_p6 = por %p3269_p5, %p3268_p4 }
   0xd   :  { %p3271_p7 = pnand %p3270_p6, %p3264_p3 }
   0xf   :  { %3274 = shalt.err (!%p3271_p7)
}
  0x10   :  { %s3302_s25 = smov 384   ;;  %s3303_s26 = smov 24  }
  0x11   :  { %24 = dma.hbm_to_vmem [thread:$0]  %s3448_s1, 24576, %s19_s16, [#allocation3], %s3302_s25, %s3302_s25, %s3303_s26  }
  0x12   :  { %s3304_s29 = smov [#allocation4]   ;;  %s3275_s7 = scalar_lea.hbm %s3449_s2, 9984 }
  0x13   :  { %s30_s30 = sshll.u32 %s3304_s29, 4  ;;  %p3276_p8 = scmp.ne.s32.totalorder %s3449_s2, %s3275_s7  ;;  %s31_s30 = int_to_ptr.vmem [resolvable:$true] %s30_s30 }
  0x14   :  { %p3279_p9 = scmp.lt.u32.totalorder %s3275_s7, %s3449_s2 }
  0x16   :  { %p3281_p10 = pnand %p3279_p9, %p3276_p8 }
  0x18   :  { %3284 = shalt.err (!%p3281_p10)
}
  0x19   :  { %s3285_s12 = scalar_lea.vmem %s31_s30, 9984  ;;  %p3290_p12 = scmp.lt.s32.totalorder %s31_s30, %s31_s30 }
  0x1a   :  { %p3286_p11 = scmp.ne.s32.totalorder %s31_s30, %s3285_s12  ;;  %p3291_p13 = scmp.lt.s32.totalorder %s3285_s12, %s3285_s12 }
  0x1c   :  { %p3292_p0 = por %p3291_p13, %p3290_p12 }
  0x1e   :  { %p3293_p1 = pnand %p3292_p0, %p3286_p11 }
  0x20   :  { %3296 = shalt.err (!%p3293_p1)
}
  0x21   :  { %s3305_s1 = smov 64   ;;  %s3306_s13 = smov 4  }
  0x22   :  { %36 = dma.hbm_to_vmem [thread:$0]  %s3449_s2, 9984, %s31_s30, [#allocation5], %s3305_s1, %s3305_s1, %s3306_s13  }
  0x23   :  { %3297 = dma.done.wait [#allocation3], 24576  }
  0x24   :  { %3298 = vsyncadd [#allocation3], 4294942720 }
  0x25   :  { %3299 = dma.done.wait [#allocation5], 9984  }
  0x26   :  { %3300 = vsyncadd [#allocation5], 4294957312  ;;  %v2886_v0 = vld [vmem:[#allocation2 + $0x4] ss:$24 sps:$4 sm:$0xff]   ;;  %v2888_v1 = vld [vmem:[#allocation2] ss:$24 sps:$4 sm:$0xff]   ;;  %v52_v23 = vlaneseq }
  0x27   :  { %1257 = vmatprep.subr.bf16.mxu0 %v2886_v0  ;;  %v2889_v2 = vld [vmem:[#allocation2 + $0x34] ss:$24 sps:$4 sm:$0xff]   ;;  %v2891_v3 = vld [vmem:[#allocation2 + $0x30] ss:$24 sps:$4 sm:$0xff]   ;;  %v2892_v4 = vld [vmem:[#allocation2 + $0x64] ss:$24 sps:$4 sm:$0xff]  }
  0x28   :  { %1258 = vmatpush1.bf16.msra.mxu0 %v2888_v1  ;;  %v2894_v5 = vld [vmem:[#allocation2 + $0x60] ss:$24 sps:$4 sm:$0xff]   ;;  %v2895_v6 = vld [vmem:[#allocation2 + $0x94] ss:$24 sps:$4 sm:$0xff]   ;;  %v2897_v7 = vld [vmem:[#allocation2 + $0x90] ss:$24 sps:$4 sm:$0xff]  }
  0x29   :  { %1259 = vmatprep.subr.bf16.mxu0 %v2889_v2  ;;  %v2910_v8 = vld [vmem:[#allocation2 + $0xc] ss:$24 sps:$4 sm:$0xff]   ;;  %v2914_v10 = vld [vmem:[#allocation2 + $0x8] ss:$24 sps:$4 sm:$0xff]   ;;  %v2916_v11 = vld [vmem:[#allocation2 + $0x3c] ss:$24 sps:$4 sm:$0xff]  }
  0x2a   :  { %v2898_v9 = vld [vmem:[#allocation2 + $0xc4] ss:$24 sps:$4 sm:$0xff]   ;;  %1339 = vmatprep.subr.bf16.mxu1 %v2910_v8  ;;  %v2900_v12 = vld [vmem:[#allocation2 + $0xc0] ss:$24 sps:$4 sm:$0xff]   ;;  %v2901_v13 = vld [vmem:[#allocation2 + $0xf4] ss:$24 sps:$4 sm:$0xff]  }
  0x2b   :  { %1340 = vmatpush1.bf16.msra.mxu1 %v2914_v10  ;;  %v2920_v14 = vld [vmem:[#allocation2 + $0x38] ss:$24 sps:$4 sm:$0xff]   ;;  %v2922_v15 = vld [vmem:[#allocation2 + $0x6c] ss:$24 sps:$4 sm:$0xff]   ;;  %v2926_v17 = vld [vmem:[#allocation2 + $0x68] ss:$24 sps:$4 sm:$0xff]  }
  0x2c   :  { %1260 = vmatpush1.bf16.msra.mxu0 %v2891_v3  ;;  %1341 = vmatprep.subr.bf16.mxu1 %v2916_v11  ;;  %v2903_v16 = vld [vmem:[#allocation2 + $0xf0] ss:$24 sps:$4 sm:$0xff]   ;;  %v2928_v18 = vld [vmem:[#allocation2 + $0x9c] ss:$24 sps:$4 sm:$0xff]   ;;  %v3307_v21 = vmov 1983009808  }
  0x2d   :  { %1261 = vmatprep.subr.bf16.mxu0 %v2892_v4  ;;  %v2904_v19 = vld [vmem:[#allocation2 + $0x124] ss:$24 sps:$4 sm:$0xff]   ;;  %v2932_v20 = vld [vmem:[#allocation2 + $0x98] ss:$24 sps:$4 sm:$0xff]   ;;  %v50_v22 = vunpack.c.l.s4 %v3307_v21  ;;  %v2907_v26 = vld [vmem:[#allocation2 + $0x154] ss:$24 sps:$4 sm:$0xff]  }
  0x2e   :  { %v2906_v24 = vld [vmem:[#allocation2 + $0x120] ss:$24 sps:$4 sm:$0xff]   ;;  %v2934_v25 = vld [vmem:[#allocation2 + $0xcc] ss:$24 sps:$4 sm:$0xff]   ;;  %v2909_v27 = vld [vmem:[#allocation2 + $0x150] ss:$24 sps:$4 sm:$0xff]  }
  0x2f   :  { %1342 = vmatpush1.bf16.msra.mxu1 %v2920_v14  ;;  %v2938_v28 = vld [vmem:[#allocation2 + $0xc8] ss:$24 sps:$4 sm:$0xff]   ;;  %v51_v29 = vunpack.c.0.s8 %v50_v22  ;;  %v3359_v30 = vshrl.u32 %v52_v23, 7  ;;  %v2940_v31 = vld [vmem:[#allocation2 + $0xfc] ss:$24 sps:$4 sm:$0xff]   ;;  %vm3309_vm0 = vmmov 0  }
  0x30   :  { %1262 = vmatpush1.bf16.msra.mxu0 %v2894_v5  ;;  %1343 = vmatprep.subr.bf16.mxu1 %v2922_v15  ;;  %v2912_v32 = vld [vmem:[#allocation2 + $0x184] ss:$24 sps:$4 sm:$0xff]   ;;  %v2944_v33 = vld [vmem:[#allocation2 + $0xf8] ss:$24 sps:$4 sm:$0xff]   ;;  %v2918_v37 = vld [vmem:[#allocation2 + $0x1b4] ss:$24 sps:$4 sm:$0xff]  }
  0x31   :  { %1263 = vmatprep.subr.bf16.mxu0 %v2895_v6  ;;  %v54_v34 = vsub.s32 %v51_v29, %v3359_v30  ;;  %v2915_v35 = vld [vmem:[#allocation2 + $0x180] ss:$24 sps:$4 sm:$0xff]   ;;  %v2946_v36 = vld [vmem:[#allocation2 + $0x12c] ss:$24 sps:$4 sm:$0xff]   ;;  %v2921_v39 = vld [vmem:[#allocation2 + $0x1b0] ss:$24 sps:$4 sm:$0xff]  }
  0x32   :  { %v46_v38 = vld [vmem:[%s3447_s0] sm:$0xff]  ;;  %v2952_v42 = vld [vmem:[#allocation2 + $0x15c] ss:$24 sps:$4 sm:$0xff]   ;;  %v2956_v45 = vld [vmem:[#allocation2 + $0x158] ss:$24 sps:$4 sm:$0xff]   ;;  %vm2382_vm1 = vcmask 785408  }
  0x33   :  { %1344 = vmatpush1.bf16.msra.mxu1 %v2926_v17  ;;  %v2950_v40 = vld [vmem:[#allocation2 + $0x128] ss:$24 sps:$4 sm:$0xff]   ;;  %v55_v41 = vrot.slane %v46_v38, %v54_v34  ;;  %v2924_v43 = vld [vmem:[#allocation2 + $0x1e4] ss:$24 sps:$4 sm:$0xff]   ;;  %v2930_v49 = vld [vmem:[#allocation2 + $0x214] ss:$24 sps:$4 sm:$0xff]   ;;  %v48_v62 = vcombine.high %v46_v38, %v46_v38 }
  0x34   :  { %1264 = vmatpush1.bf16.msra.mxu0 %v2897_v7  ;;  %1345 = vmatprep.subr.bf16.mxu1 %v2928_v18  ;;  %v2927_v47 = vld [vmem:[#allocation2 + $0x1e0] ss:$24 sps:$4 sm:$0xff]   ;;  %v2958_v48 = vld [vmem:[#allocation2 + $0x18c] ss:$24 sps:$4 sm:$0xff]   ;;  %v2933_v50 = vld [vmem:[#allocation2 + $0x210] ss:$24 sps:$4 sm:$0xff]  }
  0x35   :  { %1265 = vmatprep.subr.bf16.mxu0 %v2898_v9  ;;  %v63_v44 = vcombine.high %v55_v41, %v55_v41  ;;  %v2963_v51 = vld [vmem:[#allocation2 + $0x188] ss:$24 sps:$4 sm:$0xff]   ;;  %v2964_v52 = vld [vmem:[#allocation2 + $0x1bc] ss:$24 sps:$4 sm:$0xff]   ;;  %v2969_v54 = vld [vmem:[#allocation2 + $0x1b8] ss:$24 sps:$4 sm:$0xff]   ;;  %v3369_v3 = vrot.slane %v48_v62, %v54_v34  ;;  %v3373_v10 = vpack.c.bf16 %v55_v41, %v55_v41 }
  0x36   :  { %v2936_v53 = vld [vmem:[#allocation2 + $0x244] ss:$24 sps:$4 sm:$0xff]   ;;  %v2939_v55 = vld [vmem:[#allocation2 + $0x240] ss:$24 sps:$4 sm:$0xff]   ;;  %v2942_v57 = vld [vmem:[#allocation2 + $0x274] ss:$24 sps:$4 sm:$0xff]  }
  0x37   :  { %1346 = vmatpush1.bf16.msra.mxu1 %v2932_v20  ;;  %v3365_v46 = vpack.c.bf16 %v63_v44, %v63_v44  ;;  %v2970_v56 = vld [vmem:[#allocation2 + $0x1ec] ss:$24 sps:$4 sm:$0xff]   ;;  %v2945_v58 = vld [vmem:[#allocation2 + $0x270] ss:$24 sps:$4 sm:$0xff]   ;;  %v2976_v60 = vld [vmem:[#allocation2 + $0x21c] ss:$24 sps:$4 sm:$0xff]   ;;  %v64_v8 = vcombine.high %v3369_v3, %v3369_v3 }
  0x38   :  { %1266 = vmatpush1.bf16.msra.mxu0 %v2900_v12  ;;  %1347 = vmatprep.subr.bf16.mxu1 %v2934_v25  ;;  %v2975_v59 = vld [vmem:[#allocation2 + $0x1e8] ss:$24 sps:$4 sm:$0xff]   ;;  %v2948_v61 = vld [vmem:[#allocation2 + $0x2a4] ss:$24 sps:$4 sm:$0xff]   ;;  %v2981_v0 = vld [vmem:[#allocation2 + $0x218] ss:$24 sps:$4 sm:$0xff]  }
  0x39   :  { %1267 = vmatprep.subr.bf16.mxu0 %v2901_v13  ;;  %1289 = vmatprep.mubr.bf16.mxu0 %v3365_v46  ;;  %v2951_v63 = vld [vmem:[#allocation2 + $0x2a0] ss:$24 sps:$4 sm:$0xff]   ;;  %v2982_v1 = vld [vmem:[#allocation2 + $0x24c] ss:$24 sps:$4 sm:$0xff]   ;;  %v2957_v4 = vld [vmem:[#allocation2 + $0x2d0] ss:$24 sps:$4 sm:$0xff]   ;;  %v3375_v14 = vpack.c.bf16 %v64_v8, %v64_v8 }
  0x3a   :  { %1371 = vmatprep.mubr.bf16.mxu1 %v3365_v46  ;;  %v2954_v2 = vld [vmem:[#allocation2 + $0x2d4] ss:$24 sps:$4 sm:$0xff]   ;;  %v2987_v5 = vld [vmem:[#allocation2 + $0x248] ss:$24 sps:$4 sm:$0xff]   ;;  %v2962_v7 = vld [vmem:[#allocation2 + $0x304] ss:$24 sps:$4 sm:$0xff]  }
  0x3b   :  { %1348 = vmatpush1.bf16.msra.mxu1 %v2938_v28  ;;  %v2988_v6 = vld [vmem:[#allocation2 + $0x27c] ss:$24 sps:$4 sm:$0xff]   ;;  %v2960_v9 = vld [vmem:[#allocation2 + $0x300] ss:$24 sps:$4 sm:$0xff]   ;;  %v2994_v12 = vld [vmem:[#allocation2 + $0x2ac] ss:$24 sps:$4 sm:$0xff]  }
  0x3c   :  { %1268 = vmatpush1.bf16.msra.mxu0 %v2903_v16  ;;  %1349 = vmatprep.subr.bf16.mxu1 %v2940_v31  ;;  %v2993_v11 = vld [vmem:[#allocation2 + $0x278] ss:$24 sps:$4 sm:$0xff]   ;;  %v2968_v13 = vld [vmem:[#allocation2 + $0x334] ss:$24 sps:$4 sm:$0xff]   ;;  %v2999_v16 = vld [vmem:[#allocation2 + $0x2a8] ss:$24 sps:$4 sm:$0xff]  }
  0x3d   :  { %1269 = vmatprep.subr.bf16.mxu0 %v2904_v19  ;;  %v2966_v15 = vld [vmem:[#allocation2 + $0x330] ss:$24 sps:$4 sm:$0xff]   ;;  %v3000_v17 = vld [vmem:[#allocation2 + $0x2dc] ss:$24 sps:$4 sm:$0xff]   ;;  %v2972_v19 = vld [vmem:[#allocation2 + $0x360] ss:$24 sps:$4 sm:$0xff]  }
  0x3e   :  { %v2974_v18 = vld [vmem:[#allocation2 + $0x364] ss:$24 sps:$4 sm:$0xff]   ;;  %v3005_v20 = vld [vmem:[#allocation2 + $0x2d8] ss:$24 sps:$4 sm:$0xff]   ;;  %v2980_v22 = vld [vmem:[#allocation2 + $0x394] ss:$24 sps:$4 sm:$0xff]  }
  0x3f   :  { %1350 = vmatpush1.bf16.msra.mxu1 %v2944_v33  ;;  %v3008_v21 = vld [vmem:[#allocation2 + $0x30c] ss:$24 sps:$4 sm:$0xff]   ;;  %v2978_v23 = vld [vmem:[#allocation2 + $0x390] ss:$24 sps:$4 sm:$0xff]   ;;  %v3014_v25 = vld [vmem:[#allocation2 + $0x33c] ss:$24 sps:$4 sm:$0xff]  }
  0x40   :  { %1270 = vmatpush1.bf16.msra.mxu0 %v2906_v24  ;;  %1351 = vmatprep.subr.bf16.mxu1 %v2946_v36  ;;  %v3006_v24 = vld [vmem:[#allocation2 + $0x308] ss:$24 sps:$4 sm:$0xff]   ;;  %v3012_v28 = vld [vmem:[#allocation2 + $0x338] ss:$24 sps:$4 sm:$0xff]   ;;  %v3020_v29 = vld [vmem:[#allocation2 + $0x36c] ss:$24 sps:$4 sm:$0xff]  }
  0x41   :  { %1271 = vmatprep.subr.bf16.mxu0 %v2907_v26  ;;  %v2986_v26 = vld [vmem:[#allocation2 + $0x3c4] ss:$24 sps:$4 sm:$0xff]   ;;  %v2992_v31 = vld [vmem:[#allocation2 + $0x3f4] ss:$24 sps:$4 sm:$0xff]   ;;  %v3018_v33 = vld [vmem:[#allocation2 + $0x368] ss:$24 sps:$4 sm:$0xff]  }
  0x42   :  { %v3026_v34 = vld [vmem:[#allocation2 + $0x39c] ss:$24 sps:$4 sm:$0xff]   ;;  %v2996_v36 = vld [vmem:[#allocation2 + $0x420] ss:$24 sps:$4 sm:$0xff]   ;;  %v3032_v38 = vld [vmem:[#allocation2 + $0x3cc] ss:$24 sps:$4 sm:$0xff]  }
  0x43   :  { %1352 = vmatpush1.bf16.msra.mxu1 %v2950_v40  ;;  %v3002_v40 = vld [vmem:[#allocation2 + $0x450] ss:$24 sps:$4 sm:$0xff]   ;;  %v3009_v44 = vld [vmem:[#allocation2 + $0x480] ss:$24 sps:$4 sm:$0xff]   ;;  %v3081_v8 = vld [vmem:[#allocation2 + $0x54c] ss:$24 sps:$4 sm:$0xff]  }
  0x44   :  { %1272 = vmatpush1.bf16.msra.mxu0 %v2909_v27  ;;  %1353 = vmatprep.subr.bf16.mxu1 %v2952_v42  ;;  %v2984_v27 = vld [vmem:[#allocation2 + $0x3c0] ss:$24 sps:$4 sm:$0xff]   ;;  %v3038_v42 = vld [vmem:[#allocation2 + $0x3fc] ss:$24 sps:$4 sm:$0xff]   ;;  %vm2434_vm2 = vcmask 41984  }
  0x45   :  { %1273 = vmatprep.subr.bf16.mxu0 %v2912_v32  ;;  %v2990_v32 = vld [vmem:[#allocation2 + $0x3f0] ss:$24 sps:$4 sm:$0xff]  }
  0x46   :  { %v3030_v41 = vld [vmem:[#allocation2 + $0x3c8] ss:$24 sps:$4 sm:$0xff]   ;;  %v3061_v62 = vld [vmem:[#allocation2 + $0x4b8] ss:$24 sps:$4 sm:$0xff]  }
  0x47   :  { %1354 = vmatpush1.bf16.msra.mxu1 %v2956_v45  ;;  %v3036_v45 = vld [vmem:[#allocation2 + $0x3f8] ss:$24 sps:$4 sm:$0xff]  }
  0x48   :  { %1274 = vmatpush1.bf16.msra.mxu0 %v2915_v35  ;;  %1355 = vmatprep.subr.bf16.mxu1 %v2958_v48  ;;  %v2998_v35 = vld [vmem:[#allocation2 + $0x424] ss:$24 sps:$4 sm:$0xff]   ;;  %v3017_v48 = vld [vmem:[#allocation2 + $0x4b4] ss:$24 sps:$4 sm:$0xff]  }
  0x49   :  { %1275 = vmatprep.subr.bf16.mxu0 %v2918_v37  ;;  %v3024_v37 = vld [vmem:[#allocation2 + $0x398] ss:$24 sps:$4 sm:$0xff]  }
  0x4b   :  { %1356 = vmatpush1.bf16.msra.mxu1 %v2963_v51  ;;  %v3050_v51 = vld [vmem:[#allocation2 + $0x45c] ss:$24 sps:$4 sm:$0xff]  }
  0x4c   :  { %1276 = vmatpush1.bf16.msra.mxu0 %v2921_v39  ;;  %1357 = vmatprep.subr.bf16.mxu1 %v2964_v52  ;;  %v3004_v39 = vld [vmem:[#allocation2 + $0x454] ss:$24 sps:$4 sm:$0xff]   ;;  %v3023_v52 = vld [vmem:[#allocation2 + $0x4e4] ss:$24 sps:$4 sm:$0xff]  }
  0x4d   :  { %1277 = vmatprep.subr.bf16.mxu0 %v2924_v43  ;;  %v3011_v43 = vld [vmem:[#allocation2 + $0x484] ss:$24 sps:$4 sm:$0xff]  }
  0x4f   :  { %1358 = vmatpush1.bf16.msra.mxu1 %v2969_v54  ;;  %v3048_v54 = vld [vmem:[#allocation2 + $0x458] ss:$24 sps:$4 sm:$0xff]  }
  0x50   :  { %1278 = vmatpush1.bf16.msra.mxu0 %v2927_v47  ;;  %1359 = vmatprep.subr.bf16.mxu1 %v2970_v56  ;;  %v3044_v47 = vld [vmem:[#allocation2 + $0x42c] ss:$24 sps:$4 sm:$0xff]  }
  0x51   :  { %1279 = vmatprep.subr.bf16.mxu0 %v2930_v49  ;;  %v3015_v49 = vld [vmem:[#allocation2 + $0x4b0] ss:$24 sps:$4 sm:$0xff]   ;;  %v3029_v56 = vld [vmem:[#allocation2 + $0x514] ss:$24 sps:$4 sm:$0xff]  }
  0x53   :  { %1360 = vmatpush1.bf16.msra.mxu1 %v2975_v59  ;;  %v3063_v59 = vld [vmem:[#allocation2 + $0x4bc] ss:$24 sps:$4 sm:$0xff]  }
  0x54   :  { %1280 = vmatpush1.bf16.msra.mxu0 %v2933_v50  ;;  %1361 = vmatprep.subr.bf16.mxu1 %v2976_v60  ;;  %v3042_v50 = vld [vmem:[#allocation2 + $0x428] ss:$24 sps:$4 sm:$0xff]   ;;  %v3035_v60 = vld [vmem:[#allocation2 + $0x544] ss:$24 sps:$4 sm:$0xff]  }
  0x55   :  { %1281 = vmatprep.subr.bf16.mxu0 %v2936_v53  ;;  %v3021_v53 = vld [vmem:[#allocation2 + $0x4e0] ss:$24 sps:$4 sm:$0xff]  }
  0x57   :  { %1362 = vmatpush1.bf16.msra.mxu1 %v2981_v0  ;;  %v3041_v0 = vld [vmem:[#allocation2 + $0x574] ss:$24 sps:$4 sm:$0xff]  }
  0x58   :  { %1282 = vmatpush1.bf16.msra.mxu0 %v2939_v55  ;;  %1363 = vmatprep.subr.bf16.mxu1 %v2982_v1  ;;  %v3057_v55 = vld [vmem:[#allocation2 + $0x48c] ss:$24 sps:$4 sm:$0xff]   ;;  %v3039_v1 = vld [vmem:[#allocation2 + $0x570] ss:$24 sps:$4 sm:$0xff]  }
  0x59   :  { %1283 = vmatprep.subr.bf16.mxu0 %v2942_v57  ;;  %v3027_v57 = vld [vmem:[#allocation2 + $0x510] ss:$24 sps:$4 sm:$0xff]  }
  0x5b   :  { %1364 = vmatpush1.bf16.msra.mxu1 %v2987_v5  ;;  %v3047_v5 = vld [vmem:[#allocation2 + $0x5a4] ss:$24 sps:$4 sm:$0xff]  }
  0x5c   :  { %1284 = vmatpush1.bf16.msra.mxu0 %v2945_v58  ;;  %1365 = vmatprep.subr.bf16.mxu1 %v2988_v6  ;;  %v3055_v58 = vld [vmem:[#allocation2 + $0x488] ss:$24 sps:$4 sm:$0xff]  }
  0x5d   :  { %1285 = vmatprep.subr.bf16.mxu0 %v2948_v61  ;;  %v3033_v61 = vld [vmem:[#allocation2 + $0x540] ss:$24 sps:$4 sm:$0xff]  }
  0x5e   :  { %v3045_v6 = vld [vmem:[#allocation2 + $0x5a0] ss:$24 sps:$4 sm:$0xff]  }
  0x5f   :  { %1366 = vmatpush1.bf16.msra.mxu1 %v2993_v11  ;;  %v3051_v11 = vld [vmem:[#allocation2 + $0x5d0] ss:$24 sps:$4 sm:$0xff]  }
  0x60   :  { %1286 = vmatpush1.bf16.msra.mxu0 %v2951_v63  ;;  %1367 = vmatprep.subr.bf16.mxu1 %v2994_v12  ;;  %v3069_v63 = vld [vmem:[#allocation2 + $0x4ec] ss:$24 sps:$4 sm:$0xff]   ;;  %v3079_v12 = vld [vmem:[#allocation2 + $0x548] ss:$24 sps:$4 sm:$0xff]  }
  0x61   :  { %1287 = vmatprep.subr.bf16.mxu0 %v2954_v2  ;;  %v3067_v2 = vld [vmem:[#allocation2 + $0x4e8] ss:$24 sps:$4 sm:$0xff]  }
  0x63   :  { %1368 = vmatpush1.bf16.msra.mxu1 %v2999_v16  ;;  %v3383_v16 = vpack.c.bf16 %v3369_v3, %v3369_v3  ;;  %v3070_v3 = vld [vmem:[#allocation2 + $0x70] ss:$24 sps:$4 sm:$0xff]  }
  0x64   :  { %1288 = vmatpush1.bf16.msra.mxu0 %v2957_v4  ;;  %1369 = vmatprep.subr.bf16.mxu1 %v3000_v17  ;;  %v3075_v4 = vld [vmem:[#allocation2 + $0x51c] ss:$24 sps:$4 sm:$0xff]   ;;  %v3058_v17 = vld [vmem:[#allocation2 + $0x10] ss:$24 sps:$4 sm:$0xff]  }
  0x65   :  { %1298 = vmatprep.subr.bf16.mxu0 %v2962_v7  ;;  %v3073_v7 = vld [vmem:[#allocation2 + $0x518] ss:$24 sps:$4 sm:$0xff]  }
  0x67   :  { %1290 = vmatmul.mubr.bf16.vlgmr.msra.gmra.mrb[0].mxu0 %v3373_v10  ;;  %1370 = vmatpush1.bf16.msra.mxu1 %v3005_v20  ;;  %v3066_v20 = vld [vmem:[#allocation2 + $0x44] ss:$24 sps:$4 sm:$0xff]  }
  0x68   :  { %1299 = vmatpush1.bf16.msra.mxu0 %v2960_v9  ;;  %1330 = vmatprep.mubr.bf16.mxu0 %v3375_v14  ;;  %v3053_v9 = vld [vmem:[#allocation2 + $0x5d4] ss:$24 sps:$4 sm:$0xff]  }
  0x69   :  { %1300 = vmatprep.subr.bf16.mxu0 %v2968_v13  ;;  %1380 = vmatprep.subr.bf16.mxu1 %v3008_v21  ;;  %v3087_v13 = vld [vmem:[#allocation2 + $0x57c] ss:$24 sps:$4 sm:$0xff]   ;;  %v3064_v21 = vld [vmem:[#allocation2 + $0x40] ss:$24 sps:$4 sm:$0xff]  }
  0x6a   :  { %1372 = vmatmul.mubr.bf16.vlgmr.msra.gmra.mrb[0].mxu1 %v3373_v10 }
  0x6b   :  { %1381 = vmatpush1.bf16.msra.mxu1 %v3006_v24  ;;  %1412 = vmatprep.mubr.bf16.mxu1 %v3375_v14  ;;  %v3072_v24 = vld [vmem:[#allocation2 + $0x74] ss:$24 sps:$4 sm:$0xff]  }
  0x6c   :  { %1301 = vmatpush1.bf16.msra.mxu0 %v2966_v15  ;;  %1382 = vmatprep.subr.bf16.mxu1 %v3014_v25  ;;  %v3060_v15 = vld [vmem:[#allocation2 + $0x14] ss:$24 sps:$4 sm:$0xff]   ;;  %v3097_v25 = vld [vmem:[#allocation2 + $0x5d8] ss:$24 sps:$4 sm:$0xff]  }
  0x6d   :  { %1302 = vmatprep.subr.bf16.mxu0 %v2974_v18  ;;  %v3085_v18 = vld [vmem:[#allocation2 + $0x578] ss:$24 sps:$4 sm:$0xff]  }
  0x6f   :  { %1383 = vmatpush1.bf16.msra.mxu1 %v3012_v28  ;;  %v3076_v28 = vld [vmem:[#allocation2 + $0xa0] ss:$24 sps:$4 sm:$0xff]  }
  0x70   :  { %1303 = vmatpush1.bf16.msra.mxu0 %v2972_v19  ;;  %1384 = vmatprep.subr.bf16.mxu1 %v3020_v29  ;;  %v3093_v19 = vld [vmem:[#allocation2 + $0x5ac] ss:$24 sps:$4 sm:$0xff]  }
  0x71   :  { %1304 = vmatprep.subr.bf16.mxu0 %v2980_v22  ;;  %v3091_v22 = vld [vmem:[#allocation2 + $0x5a8] ss:$24 sps:$4 sm:$0xff]  }
  0x72   :  { %v3176_v29 = vld [vmem:[#allocation4] sm:$0xff]  }
  0x73   :  { %1385 = vmatpush1.bf16.msra.mxu1 %v3018_v33  ;;  %v3178_v33 = vld [vmem:[#allocation4 + $0x8] sm:$0xff]  }
  0x74   :  { %1305 = vmatpush1.bf16.msra.mxu0 %v2978_v23  ;;  %1386 = vmatprep.subr.bf16.mxu1 %v3026_v34  ;;  %v3099_v23 = vld [vmem:[#allocation2 + $0x5dc] ss:$24 sps:$4 sm:$0xff]   ;;  %v3082_v34 = vld [vmem:[#allocation2 + $0xd0] ss:$24 sps:$4 sm:$0xff]  }
  0x75   :  { %1306 = vmatprep.subr.bf16.mxu0 %v2986_v26  ;;  %v3175_v26 = vld [vmem:[#allocation4 + $0x40] sm:$0xff]  }
  0x77   :  { %1387 = vmatpush1.bf16.msra.mxu1 %v3024_v37  ;;  %v3088_v37 = vld [vmem:[#allocation2 + $0x100] ss:$24 sps:$4 sm:$0xff]  }
  0x78   :  { %1307 = vmatpush1.bf16.msra.mxu0 %v2984_v27  ;;  %1388 = vmatprep.subr.bf16.mxu1 %v3032_v38  ;;  %v3078_v27 = vld [vmem:[#allocation2 + $0xa4] ss:$24 sps:$4 sm:$0xff]  }
  0x79   :  { %1308 = vmatprep.subr.bf16.mxu0 %v2992_v31  ;;  %v3177_v31 = vld [vmem:[#allocation4 + $0x48] sm:$0xff]   ;;  %v3181_v38 = vld [vmem:[#allocation4 + $0x58] sm:$0xff]  }
  0x7b   :  { %1389 = vmatpush1.bf16.msra.mxu1 %v3030_v41  ;;  %v3094_v41 = vld [vmem:[#allocation2 + $0x130] ss:$24 sps:$4 sm:$0xff]  }
  0x7c   :  { %1309 = vmatpush1.bf16.msra.mxu0 %v2990_v32  ;;  %1390 = vmatprep.subr.bf16.mxu1 %v3038_v42  ;;  %v3084_v32 = vld [vmem:[#allocation2 + $0xd4] ss:$24 sps:$4 sm:$0xff]   ;;  %v3183_v42 = vld [vmem:[#allocation4 + $0x60] sm:$0xff]  }
  0x7d   :  { %1310 = vmatprep.subr.bf16.mxu0 %v2998_v35  ;;  %v3090_v35 = vld [vmem:[#allocation2 + $0x104] ss:$24 sps:$4 sm:$0xff]  }
  0x7f   :  { %1391 = vmatpush1.bf16.msra.mxu1 %v3036_v45  ;;  %v3100_v45 = vld [vmem:[#allocation2 + $0x160] ss:$24 sps:$4 sm:$0xff]  }
  0x80   :  { %1311 = vmatpush1.bf16.msra.mxu0 %v2996_v36  ;;  %1392 = vmatprep.subr.bf16.mxu1 %v3044_v47  ;;  %v3180_v36 = vld [vmem:[#allocation4 + $0x10] sm:$0xff]   ;;  %v3185_v47 = vld [vmem:[#allocation4 + $0x68] sm:$0xff]  }
  0x81   :  { %1312 = vmatprep.subr.bf16.mxu0 %v3004_v39  ;;  %v3096_v39 = vld [vmem:[#allocation2 + $0x134] ss:$24 sps:$4 sm:$0xff]  }
  0x83   :  { %1393 = vmatpush1.bf16.msra.mxu1 %v3042_v50  ;;  %v3103_v50 = vld [vmem:[#allocation2 + $0x190] ss:$24 sps:$4 sm:$0xff]  }
  0x84   :  { %1313 = vmatpush1.bf16.msra.mxu0 %v3002_v40  ;;  %1394 = vmatprep.subr.bf16.mxu1 %v3050_v51  ;;  %v3182_v40 = vld [vmem:[#allocation4 + $0x18] sm:$0xff]  }
  0x85   :  { %1314 = vmatprep.subr.bf16.mxu0 %v3011_v43  ;;  %v3102_v43 = vld [vmem:[#allocation2 + $0x164] ss:$24 sps:$4 sm:$0xff]  }
  0x86   :  { %v3108_v51 = vld [vmem:[#allocation2 + $0x1c4] ss:$24 sps:$4 sm:$0xff]  }
  0x87   :  { %1395 = vmatpush1.bf16.msra.mxu1 %v3048_v54  ;;  %v3109_v54 = vld [vmem:[#allocation2 + $0x1f0] ss:$24 sps:$4 sm:$0xff]  }
  0x88   :  { %1315 = vmatpush1.bf16.msra.mxu0 %v3009_v44  ;;  %1396 = vmatprep.subr.bf16.mxu1 %v3057_v55  ;;  %v3184_v44 = vld [vmem:[#allocation4 + $0x20] sm:$0xff]  }
  0x89   :  { %1316 = vmatprep.subr.bf16.mxu0 %v3017_v48  ;;  %v3105_v48 = vld [vmem:[#allocation2 + $0x194] ss:$24 sps:$4 sm:$0xff]   ;;  %v3114_v55 = vld [vmem:[#allocation2 + $0x224] ss:$24 sps:$4 sm:$0xff]  }
  0x8b   :  { %1397 = vmatpush1.bf16.msra.mxu1 %v3055_v58  ;;  %v3115_v58 = vld [vmem:[#allocation2 + $0x250] ss:$24 sps:$4 sm:$0xff]  }
  0x8c   :  { %1317 = vmatpush1.bf16.msra.mxu0 %v3015_v49  ;;  %1398 = vmatprep.subr.bf16.mxu1 %v3063_v59  ;;  %v3186_v49 = vld [vmem:[#allocation4 + $0x28] sm:$0xff]   ;;  %v3120_v59 = vld [vmem:[#allocation2 + $0x284] ss:$24 sps:$4 sm:$0xff]  }
  0x8d   :  { %1318 = vmatprep.subr.bf16.mxu0 %v3023_v52  ;;  %v3106_v52 = vld [vmem:[#allocation2 + $0x1c0] ss:$24 sps:$4 sm:$0xff]  }
  0x8f   :  { %1399 = vmatpush1.bf16.msra.mxu1 %v3061_v62  ;;  %v3121_v62 = vld [vmem:[#allocation2 + $0x2b0] ss:$24 sps:$4 sm:$0xff]  }
  0x90   :  { %1319 = vmatpush1.bf16.msra.mxu0 %v3021_v53  ;;  %1400 = vmatprep.subr.bf16.mxu1 %v3069_v63  ;;  %v3111_v53 = vld [vmem:[#allocation2 + $0x1f4] ss:$24 sps:$4 sm:$0xff]   ;;  %v3126_v63 = vld [vmem:[#allocation2 + $0x2e4] ss:$24 sps:$4 sm:$0xff]  }
  0x91   :  { %1320 = vmatprep.subr.bf16.mxu0 %v3029_v56  ;;  %v3112_v56 = vld [vmem:[#allocation2 + $0x220] ss:$24 sps:$4 sm:$0xff]  }
  0x93   :  { %1401 = vmatpush1.bf16.msra.mxu1 %v3067_v2  ;;  %v3127_v2 = vld [vmem:[#allocation2 + $0x310] ss:$24 sps:$4 sm:$0xff]  }
  0x94   :  { %1321 = vmatpush1.bf16.msra.mxu0 %v3027_v57  ;;  %1402 = vmatprep.subr.bf16.mxu1 %v3075_v4  ;;  %v3117_v57 = vld [vmem:[#allocation2 + $0x254] ss:$24 sps:$4 sm:$0xff]   ;;  %v3132_v4 = vld [vmem:[#allocation2 + $0x344] ss:$24 sps:$4 sm:$0xff]  }
  0x95   :  { %1322 = vmatprep.subr.bf16.mxu0 %v3035_v60  ;;  %v3118_v60 = vld [vmem:[#allocation2 + $0x280] ss:$24 sps:$4 sm:$0xff]  }
  0x97   :  { %1403 = vmatpush1.bf16.msra.mxu1 %v3073_v7  ;;  %v3133_v7 = vld [vmem:[#allocation2 + $0x370] ss:$24 sps:$4 sm:$0xff]  }
  0x98   :  { %1323 = vmatpush1.bf16.msra.mxu0 %v3033_v61  ;;  %1404 = vmatprep.subr.bf16.mxu1 %v3081_v8  ;;  %v3123_v61 = vld [vmem:[#allocation2 + $0x2b4] ss:$24 sps:$4 sm:$0xff]   ;;  %v3138_v8 = vld [vmem:[#allocation2 + $0x3a4] ss:$24 sps:$4 sm:$0xff]  }
  0x99   :  { %1324 = vmatprep.subr.bf16.mxu0 %v3041_v0  ;;  %v3124_v0 = vld [vmem:[#allocation2 + $0x2e0] ss:$24 sps:$4 sm:$0xff]  }
  0x9b   :  { %1405 = vmatpush1.bf16.msra.mxu1 %v3079_v12  ;;  %v3139_v12 = vld [vmem:[#allocation2 + $0x3d0] ss:$24 sps:$4 sm:$0xff]  }
  0x9c   :  { %1325 = vmatpush1.bf16.msra.mxu0 %v3039_v1  ;;  %1406 = vmatprep.subr.bf16.mxu1 %v3087_v13  ;;  %v3129_v1 = vld [vmem:[#allocation2 + $0x314] ss:$24 sps:$4 sm:$0xff]   ;;  %v3144_v13 = vld [vmem:[#allocation2 + $0x404] ss:$24 sps:$4 sm:$0xff]  }
  0x9d   :  { %1326 = vmatprep.subr.bf16.mxu0 %v3047_v5  ;;  %v3130_v5 = vld [vmem:[#allocation2 + $0x340] ss:$24 sps:$4 sm:$0xff]  }
  0x9f   :  { %1407 = vmatpush1.bf16.msra.mxu1 %v3085_v18  ;;  %v3145_v18 = vld [vmem:[#allocation2 + $0x430] ss:$24 sps:$4 sm:$0xff]  }
  0xa0   :  { %1327 = vmatpush1.bf16.msra.mxu0 %v3045_v6  ;;  %1408 = vmatprep.subr.bf16.mxu1 %v3093_v19  ;;  %v3135_v6 = vld [vmem:[#allocation2 + $0x374] ss:$24 sps:$4 sm:$0xff]   ;;  %v3189_v19 = vld [vmem:[#allocation4 + $0x78] sm:$0xff]  }
  0xa1   :  { %1328 = vmatprep.subr.bf16.mxu0 %v3053_v9  ;;  %v3136_v9 = vld [vmem:[#allocation2 + $0x3a0] ss:$24 sps:$4 sm:$0xff]  }
  0xa3   :  { %1409 = vmatpush1.bf16.msra.mxu1 %v3091_v22  ;;  %v3148_v22 = vld [vmem:[#allocation2 + $0x460] ss:$24 sps:$4 sm:$0xff]  }
  0xa4   :  { %1329 = vmatpush1.bf16.msra.mxu0 %v3051_v11  ;;  %1410 = vmatprep.subr.bf16.mxu1 %v3099_v23  ;;  %v3141_v11 = vld [vmem:[#allocation2 + $0x3d4] ss:$24 sps:$4 sm:$0xff]   ;;  %v3191_v23 = vld [vmem:[#allocation4 + $0xc0] sm:$0xff]  }
  0xa5   :  { %1421 = vmatprep.subr.bf16.mxu0 %v3060_v15  ;;  %v3187_v15 = vld [vmem:[#allocation4 + $0x70] sm:$0xff]  }
  0xa7   :  { %1331 = vmatmul.mubr.bf16.vlgmr.msra.gmra.mrb[0].mxu0 %v3383_v16  ;;  %1411 = vmatpush1.bf16.msra.mxu1 %v3097_v25  ;;  %v3156_v25 = vld [vmem:[#allocation2 + $0x4c4] ss:$24 sps:$4 sm:$0xff]  }
  0xa8   :  { %1422 = vmatpush1.bf16.msra.mxu0 %v3058_v17  ;;  %1453 = vmatprep.mubr.bf16.mxu0 %v3365_v46  ;;  %v3179_v46 = vld [vmem:[#allocation4 + $0x50] sm:$0xff]  }
  0xa9   :  { %1423 = vmatprep.subr.bf16.mxu0 %v3066_v20  ;;  %2719 = vmatprep.subr.bf16.mxu1 %v3175_v26  ;;  %v3147_v17 = vld [vmem:[#allocation2 + $0x434] ss:$24 sps:$4 sm:$0xff]   ;;  %v3150_v20 = vld [vmem:[#allocation2 + $0x464] ss:$24 sps:$4 sm:$0xff]   ;;  %v3154_v26 = vld [vmem:[#allocation2 + $0x4c0] ss:$24 sps:$4 sm:$0xff]  }
  0xaa   :  { %1413 = vmatmul.mubr.bf16.vlgmr.msra.gmra.mrb[0].mxu1 %v3383_v16 }
  0xab   :  { %2720 = vmatpush3.bf16.msra.mxu1 %v3176_v29  ;;  %v3162_v29 = vld [vmem:[#allocation2 + $0x524] ss:$24 sps:$4 sm:$0xff]  }
  0xac   :  { %1424 = vmatpush1.bf16.msra.mxu0 %v3064_v21  ;;  %2721 = vmatprep.subr.bf16.mxu1 %v3177_v31  ;;  %v3190_v21 = vld [vmem:[#allocation4 + $0x38] sm:$0xff]  }
  0xad   :  { %1425 = vmatprep.subr.bf16.mxu0 %v3072_v24  ;;  %v3153_v24 = vld [vmem:[#allocation2 + $0x494] ss:$24 sps:$4 sm:$0xff]   ;;  %v3160_v31 = vld [vmem:[#allocation2 + $0x520] ss:$24 sps:$4 sm:$0xff]  }
  0xaf   :  { %2722 = vmatpush3.bf16.msra.mxu1 %v3178_v33  ;;  %v3163_v33 = vld [vmem:[#allocation2 + $0x550] ss:$24 sps:$4 sm:$0xff]  }
  0xb0   :  { %1426 = vmatpush1.bf16.msra.mxu0 %v3070_v3  ;;  %2723 = vmatprep.subr.bf16.mxu1 %v3179_v46  ;;  %v3151_v3 = vld [vmem:[#allocation2 + $0x490] ss:$24 sps:$4 sm:$0xff]   ;;  %v3166_v46 = vld [vmem:[#allocation2 + $0x580] ss:$24 sps:$4 sm:$0xff]  }
  0xb1   :  { %1427 = vmatprep.subr.bf16.mxu0 %v3078_v27  ;;  %v3159_v27 = vld [vmem:[#allocation2 + $0x4f4] ss:$24 sps:$4 sm:$0xff]  }
  0xb3   :  { %2724 = vmatpush3.bf16.msra.mxu1 %v3180_v36  ;;  %v3169_v36 = vld [vmem:[#allocation2 + $0x5b0] ss:$24 sps:$4 sm:$0xff]  }
  0xb4   :  { %1428 = vmatpush1.bf16.msra.mxu0 %v3076_v28  ;;  %2725 = vmatprep.subr.bf16.mxu1 %v3181_v38  ;;  %v3157_v28 = vld [vmem:[#allocation2 + $0x4f0] ss:$24 sps:$4 sm:$0xff]   ;;  %v3172_v38 = vld [vmem:[#allocation2 + $0x5e0] ss:$24 sps:$4 sm:$0xff]  }
  0xb5   :  { %1429 = vmatprep.subr.bf16.mxu0 %v3084_v32  ;;  %v3165_v32 = vld [vmem:[#allocation2 + $0x554] ss:$24 sps:$4 sm:$0xff]  }
  0xb7   :  { %2726 = vmatpush3.bf16.msra.mxu1 %v3182_v40  ;;  %v3395_v40 = vld [vmem:[%s3450_s3] sm:$0x3f] }
  0xb8   :  { %1430 = vmatpush1.bf16.msra.mxu0 %v3082_v34  ;;  %2727 = vmatprep.subr.bf16.mxu1 %v3183_v42  ;;  %v3168_v34 = vld [vmem:[#allocation2 + $0x584] ss:$24 sps:$4 sm:$0xff]  }
  0xb9   :  { %1431 = vmatprep.subr.bf16.mxu0 %v3090_v35  ;;  %v3171_v35 = vld [vmem:[#allocation2 + $0x5b4] ss:$24 sps:$4 sm:$0xff]  }
  0xbb   :  { %2728 = vmatpush3.bf16.msra.mxu1 %v3184_v44 }
  0xbc   :  { %1432 = vmatpush1.bf16.msra.mxu0 %v3088_v37  ;;  %2729 = vmatprep.subr.bf16.mxu1 %v3185_v47  ;;  %v3174_v37 = vld [vmem:[#allocation2 + $0x5e4] ss:$24 sps:$4 sm:$0xff]  }
  0xbd   :  { %1433 = vmatprep.subr.bf16.mxu0 %v3096_v39  ;;  %v269_v39 = vsub.s32 0, %v3359_v30 }
  0xbf   :  { %2730 = vmatpush3.bf16.msra.mxu1 %v3186_v49  ;;  %v270_v42 = vrot.slane %v3395_v40, %v269_v39 }
  0xc0   :  { %1434 = vmatpush1.bf16.msra.mxu0 %v3094_v41  ;;  %2731 = vmatprep.subr.bf16.mxu1 %v3187_v15  ;;  %v273_v41 = vsub.s32 1, %v3359_v30 }
  0xc1   :  { %1435 = vmatprep.subr.bf16.mxu0 %v3102_v43 }
  0xc2   :  { %v274_v43 = vrot.slane %v3395_v40, %v273_v41 }
  0xc4   :  { %1436 = vmatpush1.bf16.msra.mxu0 %v3100_v45 }
  0xc5   :  { %1437 = vmatprep.subr.bf16.mxu0 %v3105_v48 }
  0xc8   :  { %1438 = vmatpush1.bf16.msra.mxu0 %v3103_v50 }
  0xc9   :  { %1439 = vmatprep.subr.bf16.mxu0 %v3108_v51 }
  0xcc   :  { %1440 = vmatpush1.bf16.msra.mxu0 %v3106_v52  ;;  %v281_v52 = vsub.s32 3, %v3359_v30 }
  0xcd   :  { %1441 = vmatprep.subr.bf16.mxu0 %v3111_v53 }
  0xd0   :  { %1442 = vmatpush1.bf16.msra.mxu0 %v3109_v54  ;;  %v3192_v54 = vld [vmem:[#allocation4 + $0x80] sm:$0xff]  }
  0xd1   :  { %1443 = vmatprep.subr.bf16.mxu0 %v3114_v55 }
  0xd4   :  { %1444 = vmatpush1.bf16.msra.mxu0 %v3112_v56  ;;  %v3193_v56 = vld [vmem:[#allocation4 + $0xc8] sm:$0xff]  }
  0xd5   :  { %1445 = vmatprep.subr.bf16.mxu0 %v3117_v57  ;;  %v282_v57 = vrot.slane %v3395_v40, %v281_v52 }
  0xd8   :  { %1446 = vmatpush1.bf16.msra.mxu0 %v3115_v58  ;;  %v3194_v58 = vld [vmem:[#allocation4 + $0x88] sm:$0xff]  }
  0xd9   :  { %1447 = vmatprep.subr.bf16.mxu0 %v3120_v59  ;;  %v3195_v59 = vld [vmem:[#allocation4 + $0xd0] sm:$0xff]  }
  0xdc   :  { %1448 = vmatpush1.bf16.msra.mxu0 %v3118_v60 }
  0xdd   :  { %1449 = vmatprep.subr.bf16.mxu0 %v3123_v61 }
  0xe0   :  { %1450 = vmatpush1.bf16.msra.mxu0 %v3121_v62 }
  0xe1   :  { %1451 = vmatprep.subr.bf16.mxu0 %v3126_v63 }
  0xe4   :  { %1452 = vmatpush1.bf16.msra.mxu0 %v3124_v0  ;;  %v3196_v0 = vld [vmem:[#allocation4 + $0x90] sm:$0xff]  }
  0xe5   :  { %1462 = vmatprep.subr.bf16.mxu0 %v3129_v1 }
  0xe7   :  { %1454 = vmatmul.mubr.bf16.vlgmr.msra.gmra.mrb[4].mxu0 %v3373_v10  ;;  %v3142_v10 = vld [vmem:[#allocation2 + $0x400] ss:$24 sps:$4 sm:$0xff]  }
  0xe8   :  { %1463 = vmatpush1.bf16.msra.mxu0 %v3127_v2  ;;  %1494 = vmatprep.mubr.bf16.mxu0 %v3375_v14  ;;  %v3188_v14 = vld [vmem:[#allocation4 + $0x30] sm:$0xff]   ;;  %v3197_v2 = vld [vmem:[#allocation4 + $0xd8] sm:$0xff]  }
  0xe9   :  { %1464 = vmatprep.subr.bf16.mxu0 %v3132_v4  ;;  %2732 = vmatpush3.bf16.msra.mxu1 %v3188_v14  ;;  %v3205_v14 = vld [vmem:[#allocation4 + $0xf8] sm:$0xff]  }
  0xea   :  { %2733 = vmatprep.subr.bf16.mxu1 %v3189_v19  ;;  %v3206_v19 = vld [vmem:[#allocation4 + $0xb8] sm:$0xff]  }
  0xec   :  { %1465 = vmatpush1.bf16.msra.mxu0 %v3130_v5 }
  0xed   :  { %1466 = vmatprep.subr.bf16.mxu0 %v3135_v6  ;;  %2734 = vmatpush3.bf16.msra.mxu1 %v3190_v21  ;;  %v3198_v6 = vld [vmem:[#allocation4 + $0x98] sm:$0xff]  }
  0xee   :  { %2741 = vmatprep.subr.bf16.mxu1 %v3191_v23  ;;  %v3209_v23 = vld [vmem:[#allocation4 + $0x148] sm:$0xff]  }
  0xf0   :  { %1467 = vmatpush1.bf16.msra.mxu0 %v3133_v7  ;;  %v3199_v7 = vld [vmem:[#allocation4 + $0xe0] sm:$0xff]  }
  0xf1   :  { %1468 = vmatprep.subr.bf16.mxu0 %v3138_v8  ;;  %v277_v8 = vsub.s32 2, %v3359_v30 }
  0xf4   :  { %1469 = vmatpush1.bf16.msra.mxu0 %v3136_v9  ;;  %v3200_v9 = vld [vmem:[#allocation4 + $0xa0] sm:$0xff]  }
  0xf5   :  { %1470 = vmatprep.subr.bf16.mxu0 %v3141_v11  ;;  %v3201_v11 = vld [vmem:[#allocation4 + $0xe8] sm:$0xff]  }
  0xf8   :  { %1471 = vmatpush1.bf16.msra.mxu0 %v3139_v12  ;;  %v278_v12 = vrot.slane %v3395_v40, %v277_v8  ;;  %v3238_v8 = vld [vmem:[#allocation4 + $0x1b8] sm:$0xff]  }
  0xf9   :  { %1472 = vmatprep.subr.bf16.mxu0 %v3144_v13  ;;  %v3202_v13 = vld [vmem:[#allocation4 + $0xa8] sm:$0xff]  }
  0xfc   :  { %1473 = vmatpush1.bf16.msra.mxu0 %v3142_v10  ;;  %v3203_v10 = vld [vmem:[#allocation4 + $0xf0] sm:$0xff]  }
  0xfd   :  { %1474 = vmatprep.subr.bf16.mxu0 %v3147_v17  ;;  %v3204_v17 = vld [vmem:[#allocation4 + $0xb0] sm:$0xff]  }
 0x100   :  { %1475 = vmatpush1.bf16.msra.mxu0 %v3145_v18 }
 0x101   :  { %1476 = vmatprep.subr.bf16.mxu0 %v3150_v20  ;;  %v3207_v20 = vld [vmem:[#allocation4 + $0x140] sm:$0xff]  }
 0x104   :  { %1477 = vmatpush1.bf16.msra.mxu0 %v3148_v22  ;;  %v3208_v22 = vld [vmem:[#allocation4 + $0x100] sm:$0xff]  }
 0x105   :  { %1478 = vmatprep.subr.bf16.mxu0 %v3153_v24  ;;  %v3210_v24 = vld [vmem:[#allocation4 + $0x108] sm:$0xff]  }
 0x108   :  { %1479 = vmatpush1.bf16.msra.mxu0 %v3151_v3  ;;  %v3211_v3 = vld [vmem:[#allocation4 + $0x150] sm:$0xff]  }
 0x109   :  { %1480 = vmatprep.subr.bf16.mxu0 %v3156_v25  ;;  %v3212_v25 = vld [vmem:[#allocation4 + $0x110] sm:$0xff]  }
 0x10c   :  { %1481 = vmatpush1.bf16.msra.mxu0 %v3154_v26  ;;  %v3213_v26 = vld [vmem:[#allocation4 + $0x158] sm:$0xff]  }
 0x10d   :  { %1482 = vmatprep.subr.bf16.mxu0 %v3159_v27  ;;  %v3214_v27 = vld [vmem:[#allocation4 + $0x118] sm:$0xff]  }
 0x110   :  { %1483 = vmatpush1.bf16.msra.mxu0 %v3157_v28  ;;  %v3215_v28 = vld [vmem:[#allocation4 + $0x160] sm:$0xff]  }
 0x111   :  { %1484 = vmatprep.subr.bf16.mxu0 %v3162_v29  ;;  %v3216_v29 = vld [vmem:[#allocation4 + $0x120] sm:$0xff]  }
 0x114   :  { %1485 = vmatpush1.bf16.msra.mxu0 %v3160_v31  ;;  %v3217_v31 = vld [vmem:[#allocation4 + $0x168] sm:$0xff]  }
 0x115   :  { %1486 = vmatprep.subr.bf16.mxu0 %v3165_v32  ;;  %v3218_v32 = vld [vmem:[#allocation4 + $0x128] sm:$0xff]  }
 0x118   :  { %1487 = vmatpush1.bf16.msra.mxu0 %v3163_v33  ;;  %v3219_v33 = vld [vmem:[#allocation4 + $0x170] sm:$0xff]  }
 0x119   :  { %1488 = vmatprep.subr.bf16.mxu0 %v3168_v34  ;;  %v3220_v34 = vld [vmem:[#allocation4 + $0x130] sm:$0xff]  }
 0x11c   :  { %1489 = vmatpush1.bf16.msra.mxu0 %v3166_v46  ;;  %v3221_v46 = vld [vmem:[#allocation4 + $0x178] sm:$0xff]  }
 0x11d   :  { %1490 = vmatprep.subr.bf16.mxu0 %v3171_v35  ;;  %v3222_v35 = vld [vmem:[#allocation4 + $0x138] sm:$0xff]  }
 0x120   :  { %1491 = vmatpush1.bf16.msra.mxu0 %v3169_v36  ;;  %v3223_v36 = vld [vmem:[#allocation4 + $0x1c0] sm:$0xff]  }
 0x121   :  { %1492 = vmatprep.subr.bf16.mxu0 %v3174_v37  ;;  %v285_v37 = vsub.s32 4, %v3359_v30 }
 0x123   :  { %v286_v39 = vrot.slane %v3395_v40, %v285_v37 }
 0x124   :  { %1493 = vmatpush1.bf16.msra.mxu0 %v3172_v38  ;;  %v289_v38 = vsub.s32 5, %v3359_v30  ;;  %v3240_v30 = vld [vmem:[#allocation4 + $0x208] sm:$0xff]  }
 0x126   :  { %v290_v41 = vrot.slane %v3395_v40, %v289_v38  ;;  %v3226_v40 = vld [vmem:[#allocation4 + $0x188] sm:$0xff]  }
 0x127   :  { %1495 = vmatmul.mubr.bf16.vlgmr.msra.gmra.mrb[4].mxu0 %v3383_v16 }
 0x17a   :  { %v1332_v44 = vpop.f32.mrb[0].mxu0 }
 0x17b   :  { %v2859_v45 = vadd.f32 %v1332_v44, %v270_v42  ;;  %v1334_v47 = vpop.f32.mrb[1].mxu0 }
 0x17c   :  { %v2860_v48 = vadd.f32 %v1334_v47, %v274_v43  ;;  %v1336_v49 = vpop.f32.mrb[2].mxu0 }
 0x17d   :  { %v1503_v50 = vmax.f32 %v2859_v45, 0.0  ;;  %v1337_v16 = vpop.f32.mrb[3].mxu0  ;;  %v1414_v60 = vpop.f32.mrb[0].mxu1 }
 0x17e   :  { %v1504_v51 = vmax.f32 %v2860_v48, 0.0  ;;  %v1416_v61 = vpop.f32.mrb[1].mxu1  ;;  %v2861_v15 = vadd.f32 %v1414_v60, %v278_v12  ;;  %v3242_v60 = vld [vmem:[#allocation4 + $0x218] sm:$0xff]  }
 0x17f   :  { %v1509_v55 = vpack.c.bf16 %v1503_v50, %v1503_v50  ;;  %v2862_v62 = vadd.f32 %v1416_v61, %v282_v57  ;;  %v1418_v63 = vpop.f32.mrb[2].mxu1  ;;  %v3241_v57 = vld [vmem:[#allocation4 + $0x210] sm:$0xff]   ;;  %v3230_v61 = vld [vmem:[#allocation4 + $0x198] sm:$0xff]  }
 0x180   :  { %v1510_v53 = vpack.c.bf16 %v1504_v51, %v1504_v51  ;;  %v1419_v1 = vpop.f32.mrb[3].mxu1  ;;  %v1505_v18 = vmax.f32 %v2861_v15, 0.0  ;;  %v3224_v51 = vld [vmem:[#allocation4 + $0x180] sm:$0xff]  }
 0x181   :  { %v1506_v4 = vmax.f32 %v2862_v62, 0.0  ;;  %v3231_v62 = vld [vmem:[#allocation4 + $0x1e0] sm:$0xff]   ;;  %v3233_v1 = vld [vmem:[#allocation4 + $0x1e8] sm:$0xff]  }
 0x182   :  { %1682 = vmatprep.mubr.bf16.mxu1 %v1510_v53  ;;  %v1511_v21 = vpack.c.bf16 %v1505_v18, %v1505_v18  ;;  %v3225_v53 = vld [vmem:[#allocation4 + $0x1c8] sm:$0xff]   ;;  %v3243_v63 = vld [vmem:[#allocation4 + $0x220] sm:$0xff]  }
 0x183   :  { %1683 = vmatmul.mubr.bf16.vlgmr.msra.gmra.mrb[4].mxu1 %v1509_v55  ;;  %v1512_v5 = vpack.c.bf16 %v1506_v4, %v1506_v4  ;;  %v3308_v55 = vmov 0.0   ;;  %v3234_v4 = vld [vmem:[#allocation4 + $0x1a8] sm:$0xff]  }
 0x184   :  { %2742 = vmatpush3.bf16.msra.mxu1 %v3192_v54  ;;  %v3239_v54 = vld [vmem:[#allocation4 + $0x200] sm:$0xff]   ;;  %2823 = vmatprep.subr.bf16.mxu0 %v3308_v55 }
 0x185   :  { %2743 = vmatprep.subr.bf16.mxu1 %v3193_v56  ;;  %1858 = vmatprep.mubr.bf16.mxu1 %v1512_v5  ;;  %v3227_v56 = vld [vmem:[#allocation4 + $0x1d0] sm:$0xff]  }
 0x186   :  { %2824 = vmatpush3.bf16.msra.mxu0 %v3239_v54  ;;  %v3235_v5 = vld [vmem:[#allocation4 + $0x1f0] sm:$0xff]   ;;  %2839 = vmatprep.mubr.msk.bf16.mxu0 %vm3309_vm0, %v3308_v55 }
 0x187   :  { %2825 = vmatprep.subr.bf16.mxu0 %v3308_v55 }
 0x188   :  { %2744 = vmatpush3.bf16.msra.mxu1 %v3194_v58  ;;  %v3228_v58 = vld [vmem:[#allocation4 + $0x190] sm:$0xff]  }
 0x189   :  { %2745 = vmatprep.subr.bf16.mxu1 %v3195_v59  ;;  %v3229_v59 = vld [vmem:[#allocation4 + $0x1d8] sm:$0xff]  }
 0x18a   :  { %2826 = vmatpush3.bf16.msra.mxu0 %v3240_v30 }
 0x18b   :  { %2827 = vmatprep.subr.bf16.mxu0 %v3308_v55 }
 0x18c   :  { %2746 = vmatpush3.bf16.msra.mxu1 %v3196_v0  ;;  %v3232_v0 = vld [vmem:[#allocation4 + $0x1a0] sm:$0xff]  }
 0x18d   :  { %2747 = vmatprep.subr.bf16.mxu1 %v3197_v2  ;;  %v3244_v2 = vld [vmem:[#allocation4 + $0x228] sm:$0xff]  }
 0x18e   :  { %2828 = vmatpush3.bf16.msra.mxu0 %v3241_v57  ;;  %v2710_v57 = vld [vmem:[%s3450_s3 + $0xa] ss:$0 sm:$0xff] }
 0x18f   :  { %2829 = vmatprep.subr.bf16.mxu0 %v3308_v55 }
 0x190   :  { %2748 = vmatpush3.bf16.msra.mxu1 %v3198_v6  ;;  %v3236_v6 = vld [vmem:[#allocation4 + $0x1b0] sm:$0xff]  }
 0x191   :  { %2749 = vmatprep.subr.bf16.mxu1 %v3199_v7  ;;  %v3237_v7 = vld [vmem:[#allocation4 + $0x1f8] sm:$0xff]  }
 0x192   :  { %2830 = vmatpush3.bf16.msra.mxu0 %v3242_v60 }
 0x193   :  { %2831 = vmatprep.subr.bf16.mxu0 %v3308_v55 }
 0x194   :  { %2750 = vmatpush3.bf16.msra.mxu1 %v3200_v9 }
 0x195   :  { %2751 = vmatprep.subr.bf16.mxu1 %v3201_v11 }
 0x196   :  { %2832 = vmatpush3.bf16.msra.mxu0 %v3243_v63 }
 0x197   :  { %2833 = vmatprep.subr.bf16.mxu0 %v3308_v55 }
 0x198   :  { %2752 = vmatpush3.bf16.msra.mxu1 %v3202_v13 }
 0x199   :  { %2753 = vmatprep.subr.bf16.mxu1 %v3203_v10  ;;  %v3245_v10 = vld [vmem:[#allocation4 + $0x230] sm:$0xff]  }
 0x19a   :  { %2834 = vmatpush3.bf16.msra.mxu0 %v3244_v2 }
 0x19b   :  { %2835 = vmatprep.subr.bf16.mxu0 %v3308_v55 }
 0x19c   :  { %2754 = vmatpush3.bf16.msra.mxu1 %v3204_v17  ;;  %v3246_v17 = vld [vmem:[#allocation4 + $0x238] sm:$0xff]  }
 0x19d   :  { %2755 = vmatprep.subr.bf16.mxu1 %v3205_v14  ;;  %v2634_v14 = vld [vmem:[%s3450_s3 + $0x6] ss:$0 sm:$0xff] }
 0x19e   :  { %2836 = vmatpush3.bf16.msra.mxu0 %v3245_v10 }
 0x19f   :  { %2837 = vmatprep.subr.bf16.mxu0 %v3308_v55 }
 0x1a0   :  { %2756 = vmatpush3.bf16.msra.mxu1 %v3206_v19 }
 0x1a1   :  { %2763 = vmatprep.subr.bf16.mxu1 %v3207_v20  ;;  %v2651_v20 = vld [vmem:[%s3450_s3 + $0x7] ss:$0 sm:$0xff] }
 0x1a2   :  { %2838 = vmatpush3.bf16.msra.mxu0 %v3246_v17 }
 0x1a3   :  { %1859 = vmatmul.mubr.bf16.vlgmr.msra.gmra.mrb[8].mxu1 %v1511_v21 }
 0x1a4   :  { %2764 = vmatpush3.bf16.msra.mxu1 %v3208_v22 }
 0x1a5   :  { %2765 = vmatprep.subr.bf16.mxu1 %v3209_v23 }
 0x1a8   :  { %2766 = vmatpush3.bf16.msra.mxu1 %v3210_v24 }
 0x1a9   :  { %2767 = vmatprep.subr.bf16.mxu1 %v3211_v3 }
 0x1ac   :  { %2768 = vmatpush3.bf16.msra.mxu1 %v3212_v25 }
 0x1ad   :  { %2769 = vmatprep.subr.bf16.mxu1 %v3213_v26 }
 0x1b0   :  { %2770 = vmatpush3.bf16.msra.mxu1 %v3214_v27 }
 0x1b1   :  { %2771 = vmatprep.subr.bf16.mxu1 %v3215_v28 }
 0x1b4   :  { %2772 = vmatpush3.bf16.msra.mxu1 %v3216_v29 }
 0x1b5   :  { %2773 = vmatprep.subr.bf16.mxu1 %v3217_v31  ;;  %v2668_v31 = vld [vmem:[%s3450_s3 + $0x8] ss:$0 sm:$0xff] }
 0x1b8   :  { %2774 = vmatpush3.bf16.msra.mxu1 %v3218_v32 }
 0x1b9   :  { %2775 = vmatprep.subr.bf16.mxu1 %v3219_v33  ;;  %v3247_v33 = vld [vmem:[#allocation4 + $0x240] sm:$0xff]  }
 0x1bc   :  { %2776 = vmatpush3.bf16.msra.mxu1 %v3220_v34 }
 0x1bd   :  { %2777 = vmatprep.subr.bf16.mxu1 %v3221_v46 }
 0x1c0   :  { %2778 = vmatpush3.bf16.msra.mxu1 %v3222_v35 }
 0x1c1   :  { %2785 = vmatprep.subr.bf16.mxu1 %v3223_v36  ;;  %v3248_v36 = vld [vmem:[#allocation4 + $0x248] sm:$0xff]  }
 0x1fa   :  { %v1496_v42 = vpop.f32.mrb[4].mxu0 }
 0x1fb   :  { %v2863_v43 = vadd.f32 %v1496_v42, %v286_v39  ;;  %v1498_v44 = vpop.f32.mrb[5].mxu0  ;;  %v3249_v39 = vld [vmem:[#allocation4 + $0x250] sm:$0xff]   ;;  %v3250_v42 = vld [vmem:[#allocation4 + $0x258] sm:$0xff]  }
 0x1fc   :  { %v2864_v45 = vadd.f32 %v1498_v44, %v290_v41  ;;  %v1500_v47 = vpop.f32.mrb[6].mxu0  ;;  %v3252_v44 = vld [vmem:[#allocation4 + $0x268] sm:$0xff]  }
 0x1fd   :  { %v1507_v48 = vmax.f32 %v2863_v43, 0.0  ;;  %v1501_v49 = vpop.f32.mrb[7].mxu0  ;;  %v3251_v43 = vld [vmem:[#allocation4 + $0x260] sm:$0xff]  }
 0x1fe   :  { %v1508_v50 = vmax.f32 %v2864_v45, 0.0 }
 0x1ff   :  { %v1513_v52 = vpack.c.bf16 %v1507_v48, %v1507_v48 }
 0x200   :  { %v1514_v16 = vpack.c.bf16 %v1508_v50, %v1508_v50 }
 0x202   :  { %2034 = vmatprep.mubr.bf16.mxu1 %v1514_v16  ;;  %v2685_v16 = vld [vmem:[%s3450_s3 + $0x9] ss:$0 sm:$0xff] }
 0x203   :  { %2035 = vmatmul.mubr.bf16.vlgmr.msra.gmra.mrb[12].mxu1 %v1513_v52 }
 0x204   :  { %2786 = vmatpush3.bf16.msra.mxu1 %v3224_v51 }
 0x205   :  { %2787 = vmatprep.subr.bf16.mxu1 %v3225_v53 }
 0x208   :  { %2788 = vmatpush3.bf16.msra.mxu1 %v3226_v40 }
 0x209   :  { %2789 = vmatprep.subr.bf16.mxu1 %v3227_v56 }
 0x20c   :  { %2790 = vmatpush3.bf16.msra.mxu1 %v3228_v58 }
 0x20d   :  { %2791 = vmatprep.subr.bf16.mxu1 %v3229_v59  ;;  %v2718_v59 = vld [vmem:[%s3450_s3 + $0xb] ss:$0 sm:$0xff] }
 0x210   :  { %2792 = vmatpush3.bf16.msra.mxu1 %v3230_v61 }
 0x211   :  { %2793 = vmatprep.subr.bf16.mxu1 %v3231_v62 }
 0x214   :  { %2794 = vmatpush3.bf16.msra.mxu1 %v3232_v0 }
 0x215   :  { %2795 = vmatprep.subr.bf16.mxu1 %v3233_v1 }
 0x218   :  { %2796 = vmatpush3.bf16.msra.mxu1 %v3234_v4 }
 0x219   :  { %2797 = vmatprep.subr.bf16.mxu1 %v3235_v5 }
 0x21c   :  { %2798 = vmatpush3.bf16.msra.mxu1 %v3236_v6 }
 0x21d   :  { %2799 = vmatprep.subr.bf16.mxu1 %v3237_v7 }
 0x220   :  { %2800 = vmatpush3.bf16.msra.mxu1 %v3238_v8 }
 0x221   :  { %2843 = vmatprep.subr.bf16.mxu1 %v3308_v55 }
 0x256   :  { %v2735_v9 = vpop.f32.mrb[4].mxu1 }
 0x257   :  { %v2736_v11 = vpop.f32.mrb[5].mxu1 }
 0x258   :  { %v2737_v12 = vadd.f32 %v2736_v11, %v2735_v9  ;;  %v2738_v13 = vpop.f32.mrb[6].mxu1 }
 0x259   :  { %v2739_v15 = vpop.f32.mrb[7].mxu1 }
 0x25a   :  { %v1685_v19 = vadd.f32 %v2737_v12, %v2634_v14 }
 0x25c   :  { %v1690_v25 = vmax.f32 %v1685_v19, 0.0 }
 0x25e   :  { %v2043_v28 = vpack.c.bf16 %v1690_v25, %v1690_v25 }
 0x276   :  { %v2757_v18 = vpop.f32.mrb[8].mxu1 }
 0x277   :  { %v2758_v21 = vpop.f32.mrb[9].mxu1 }
 0x278   :  { %v2759_v22 = vadd.f32 %v2758_v21, %v2757_v18  ;;  %v2760_v23 = vpop.f32.mrb[10].mxu1 }
 0x279   :  { %v2761_v24 = vpop.f32.mrb[11].mxu1 }
 0x27a   :  { %v1861_v3 = vadd.f32 %v2759_v22, %v2651_v20 }
 0x27c   :  { %v1866_v26 = vmax.f32 %v1861_v3, 0.0 }
 0x27e   :  { %v2044_v27 = vpack.c.bf16 %v1866_v26, %v1866_v26 }
 0x280   :  { %2277 = vmatprep.mubr.bf16.mxu1 %v2044_v27 }
 0x281   :  { %2278 = vmatmul.mubr.bf16.vlgmr.msra.gmra.mrb[16].mxu1 %v2043_v28 }
 0x282   :  { %2855 = vmatprep.mubr.msk.bf16.mxu1 %vm3309_vm0, %v3308_v55  ;;  %2844 = vmatpush3.bf16.msra.mxu1 %v3247_v33 }
 0x283   :  { %2845 = vmatprep.subr.bf16.mxu1 %v3308_v55 }
 0x286   :  { %2846 = vmatpush3.bf16.msra.mxu1 %v3248_v36 }
 0x287   :  { %2847 = vmatprep.subr.bf16.mxu1 %v3308_v55 }
 0x28a   :  { %2848 = vmatpush3.bf16.msra.mxu1 %v3249_v39 }
 0x28b   :  { %2849 = vmatprep.subr.bf16.mxu1 %v3308_v55 }
 0x28e   :  { %2850 = vmatpush3.bf16.msra.mxu1 %v3250_v42 }
 0x28f   :  { %2851 = vmatprep.subr.bf16.mxu1 %v3308_v55 }
 0x292   :  { %2852 = vmatpush3.bf16.msra.mxu1 %v3251_v43 }
 0x293   :  { %2853 = vmatprep.subr.bf16.mxu1 %v3308_v55 }
 0x296   :  { %2854 = vmatpush3.bf16.msra.mxu1 %v3252_v44 }
 0x2d6   :  { %v2779_v29 = vpop.f32.mrb[12].mxu1 }
 0x2d7   :  { %v2780_v32 = vpop.f32.mrb[13].mxu1 }
 0x2d8   :  { %v2781_v34 = vadd.f32 %v2780_v32, %v2779_v29  ;;  %v2782_v46 = vpop.f32.mrb[14].mxu1 }
 0x2d9   :  { %v2783_v35 = vpop.f32.mrb[15].mxu1 }
 0x2da   :  { %v2037_v37 = vadd.f32 %v2781_v34, %v2668_v31 }
 0x2dc   :  { %v2042_v38 = vmax.f32 %v2037_v37, 0.0 }
 0x2de   :  { %v2045_v41 = vpack.c.bf16 %v2042_v38, %v2042_v38 }
 0x2e0   :  { %2840 = vmatmul.mubr.bf16.vlgmr.msra.gmra.mrb[8].mxu0 %v2045_v41 }
 0x354   :  { %v2801_v45 = vpop.f32.mrb[16].mxu1 }
 0x355   :  { %v2802_v47 = vpop.f32.mrb[17].mxu1 }
 0x356   :  { %v2803_v48 = vadd.f32 %v2802_v47, %v2801_v45  ;;  %v2804_v49 = vpop.f32.mrb[18].mxu1 }
 0x357   :  { %v2805_v50 = vpop.f32.mrb[19].mxu1 }
 0x358   :  { %v2280_v51 = vadd.f32 %v2803_v48, %v2685_v16 }
 0x3b3   :  { %v2319_v52 = vpop.f32.mrb[8].mxu0 }
 0x3b4   :  { %v2320_v53 = vadd.f32 %v2319_v52, %v2280_v51  ;;  %v2841_v54 = vpop.f32.mrb[9].mxu0 }
 0x3b5   :  { %v2322_v30 = vpop.f32.mrb[10].mxu0 }
 0x3b6   :  { %v2325_v40 = vmax.f32 %v2320_v53, 0.0  ;;  %v2842_v56 = vpop.f32.mrb[11].mxu0 }
 0x3b8   :  { %v2326_v55 = vpack.c.bf16 %v2325_v40, %v2325_v40 }
 0x3ba   :  { %2856 = vmatmul.mubr.msk.bf16.vlgmr.msra.gmra.mrb[20].mxu1 %vm2382_vm1, %v2326_v55 }
 0x48d   :  { %v2420_v58 = vpop.f32.mrb[20].mxu1 }
 0x48e   :  { %v2421_v60 = vadd.f32 %v2710_v57, %v2420_v58  ;;  %v2857_v61 = vpop.f32.mrb[21].mxu1 }
 0x48f   :  { %v2423_v62 = vpop.f32.mrb[22].mxu1 }
 0x490   :  { %v2433_v63 = vmul.f32 %v2718_v59, %v2421_v60  ;;  %v2858_v0 = vpop.f32.mrb[23].mxu1 }
 0x492   :  { %2435 = vst.msk [vmem:[%s3451_s4] sm:$0x3] %vm2434_vm2, %v2433_v63 }
 0x493   :  { %2440 = vsyncpa [#allocation3], 1 }
 0x494   :  { %2441 = vsyncpa [#allocation5], 1 }

</bundles_post_ra>
